<compile_context>
chip_gen: v7x
topology: tpu7x:2x2x1
jax: 0.10.0
libtpu: 0.0.40
codegen_flags: <defaults>
</compile_context>

<pallas_src>
import jax
import jax.numpy as jnp
from jax.experimental import pallas as pl
from jax.experimental.pallas import tpu as pltpu


def _round_up(n, m):
    return ((n + m - 1) // m) * m


def _make_encoder_kernel(num_mlp_layers, activations, compute_dtype):
    """Kernel closure.

    Ref order:
      x, c,
      w0_x, w0_c, b0,
      (w_i, b_i) for i = 1 .. num_mlp_layers-1,
      w_heads, b_heads,
      heads_out                        # (TB, 2*latent): [means | relu(log_var)]
    """

    def kernel(*refs):
        x_ref, c_ref = refs[0], refs[1]
        out_ref = refs[-1]

        idx = 2
        w0x_ref, w0c_ref, b0_ref = refs[idx], refs[idx + 1], refs[idx + 2]
        idx += 3

        # Layer 0: x @ Wx + c @ Wc + b  (== cat([x, c]) @ W + b)
        h = (
            jnp.dot(x_ref[...].astype(compute_dtype), w0x_ref[...],
                    preferred_element_type=jnp.float32)
            + jnp.dot(c_ref[...].astype(compute_dtype), w0c_ref[...],
                      preferred_element_type=jnp.float32)
            + b0_ref[...]
        )
        if activations[0] is not None:
            h = activations[0](h)

        # Remaining MLP layers.
        for i in range(1, num_mlp_layers):
            w_ref, b_ref = refs[idx], refs[idx + 1]
            idx += 2
            h = jnp.dot(h.astype(compute_dtype), w_ref[...],
                        preferred_element_type=jnp.float32) + b_ref[...]
            if activations[i] is not None:
                h = activations[i](h)

        # Fused heads: one matmul producing [means | log_var].
        wh_ref, bh_ref = refs[idx], refs[idx + 1]
        heads = jnp.dot(h.astype(compute_dtype), wh_ref[...],
                        preferred_element_type=jnp.float32) + bh_ref[...]

        latent = out_ref.shape[-1] // 2
        col = jax.lax.broadcasted_iota(jnp.int32, heads.shape, 1)
        # ReLU only on the log_var half (lane-index select, no lane slicing).
        fused = jnp.where(col < latent, heads, jnp.maximum(heads, 0.0))
        out_ref[...] = fused.astype(out_ref.dtype)

    return kernel


def cvae_encoder_forward(x, c, mlp_params, means_params, logvar_params,
                         activations, *, batch_tile=256):
    """Pallas implementation of CVAEEncoder.forward.

    x: (B, Dx), c: (B, Dc)
    mlp_params: list of (W: (in, out), b: (out,))
    means_params / logvar_params: (W: (in, out), b: (out,))
    activations: list (len == len(mlp_params)) of elementwise fns or None
    Returns (means, logvars), each (B, latent) f32.
    """
    assert len(mlp_params) >= 1
    B, Dx = x.shape
    Dc = c.shape[1]
    latent = means_params[0].shape[1]
    wdtype = jnp.bfloat16  # weight / dot-input compute dtype

    # --- batch tiling / padding (sublane-aligned) ---------------------------
    b_pad8 = _round_up(max(B, 1), 8)
    tb = min(batch_tile, b_pad8)
    tb = _round_up(tb, 8)
    b_padded = _round_up(B, tb)
    if b_padded != B:
        x = jnp.pad(x, ((0, b_padded - B), (0, 0)))
        c = jnp.pad(c, ((0, b_padded - B), (0, 0)))

    # --- parameter packing ---------------------------------------------------
    w0, b0 = mlp_params[0]
    w0_x = w0[:Dx, :].astype(wdtype)
    w0_c = w0[Dx:, :].astype(wdtype)
    b0 = b0.reshape(1, -1).astype(jnp.float32)

    w_heads = jnp.concatenate([means_params[0], logvar_params[0]], axis=1).astype(wdtype)
    b_heads = jnp.concatenate([means_params[1], logvar_params[1]]).reshape(1, -1).astype(jnp.float32)

    flat_inputs = [x, c, w0_x, w0_c, b0]
    for (w, b) in mlp_params[1:]:
        flat_inputs += [w.astype(wdtype), b.reshape(1, -1).astype(jnp.float32)]
    flat_inputs += [w_heads, b_heads]

    # --- BlockSpecs -----------------------------------------------------------
    def batch_spec(arr):
        return pl.BlockSpec((tb, arr.shape[1]), lambda i: (i, 0))

    def full_spec(arr):
        return pl.BlockSpec(arr.shape, lambda i: (0, 0))

    in_specs = [batch_spec(x), batch_spec(c)] + [full_spec(a) for a in flat_inputs[2:]]
    out_specs = pl.BlockSpec((tb, 2 * latent), lambda i: (i, 0))

    # --- cost estimate --------------------------------------------------------
    layer_dims = [(Dx + Dc, mlp_params[0][1].shape[0])]
    layer_dims += [(w.shape[0], w.shape[1]) for (w, _) in mlp_params[1:]]
    layer_dims += [(w_heads.shape[0], w_heads.shape[1])]
    flops = 2 * b_padded * sum(i * o for i, o in layer_dims)
    bytes_accessed = sum(a.size * a.dtype.itemsize for a in flat_inputs) \
        + b_padded * 2 * latent * 4
    cost = pl.CostEstimate(flops=flops, transcendentals=0,
                           bytes_accessed=bytes_accessed)

    kernel = _make_encoder_kernel(len(mlp_params), activations, wdtype)

    heads_out = pl.pallas_call(
        kernel,
        out_shape=jax.ShapeDtypeStruct((b_padded, 2 * latent), jnp.float32),
        grid=(b_padded // tb,),
        in_specs=in_specs,
        out_specs=out_specs,
        compiler_params=pltpu.CompilerParams(
            dimension_semantics=("parallel",)),
        cost_estimate=cost,
    )(*flat_inputs)

    means = heads_out[:B, :latent]
    logvars = heads_out[:B, latent:]
    return means, logvars


def _init_linear(key, in_size, out_size):
    """Deterministic synthetic init (uniform, PyTorch-style fan-in bound)."""
    kw, kb = jax.random.split(key)
    bound = 1.0 / jnp.sqrt(in_size)
    w = jax.random.uniform(kw, (in_size, out_size), jnp.float32, -bound, bound)
    b = jax.random.uniform(kb, (out_size,), jnp.float32, -bound, bound)
    return w, b


def _reference(x, c, mlp_params, means_params, logvar_params, activations):
    """Plain-JAX reference using the same bf16-weight / f32-accumulate recipe."""
    def bdot(a, w):
        return jnp.dot(a.astype(jnp.bfloat16), w.astype(jnp.bfloat16),
                       preferred_element_type=jnp.float32)

    h = jnp.concatenate([x, c], axis=-1)
    for (w, b), act in zip(mlp_params, activations):
        h = bdot(h, w) + b
        if act is not None:
            h = act(h)
    means = bdot(h, means_params[0]) + means_params[1]
    logvars = jnp.maximum(bdot(h, logvar_params[0]) + logvar_params[1], 0.0)
    return means, logvars


if __name__ == "__main__":
    # Config (CVAEEncoderParams equivalent):
    #   layer_sizes       = [(24, 32), (32, 32)]   (24 = Dx + Dc)
    #   layer_activations = [ReLU, ReLU]
    B, Dx, Dc, H = 2, 16, 8, 32
    layer_sizes = [(Dx + Dc, H), (H, H)]
    relu = lambda t: jnp.maximum(t, 0.0)
    activations = [relu, relu]

    key = jax.random.PRNGKey(0)
    keys = jax.random.split(key, 2 + len(layer_sizes) + 2)

    x = jax.random.normal(keys[0], (B, Dx), jnp.float32)
    c = jax.random.normal(keys[1], (B, Dc), jnp.float32)

    mlp_params = [
        _init_linear(keys[2 + i], s_in, s_out)
        for i, (s_in, s_out) in enumerate(layer_sizes)
    ]
    means_params = _init_linear(keys[2 + len(layer_sizes)], *layer_sizes[-1])
    logvar_params = _init_linear(keys[3 + len(layer_sizes)], *layer_sizes[-1])

    means, logvars = jax.block_until_ready(
        cvae_encoder_forward(x, c, mlp_params, means_params, logvar_params,
                             activations)
    )

    means_ref, logvars_ref = _reference(
        x, c, mlp_params, means_params, logvar_params, activations)

    assert means.shape == (B, H) and logvars.shape == (B, H)
    assert jnp.allclose(means, means_ref, atol=5e-3, rtol=5e-3)
    assert jnp.allclose(logvars, logvars_ref, atol=5e-3, rtol=5e-3)

    print("KERNEL_OK")
</pallas_src>

<mosaic_0001>
module attributes {stable_mosaic.version = 11 : i64} {
  func.func @kernel(%arg0: i32, %arg1: memref<8x16xf32, #tpu.memory_space<vmem>>, %arg2: memref<8x8xf32, #tpu.memory_space<vmem>>, %arg3: memref<16x32xbf16, #tpu.memory_space<vmem>>, %arg4: memref<8x32xbf16, #tpu.memory_space<vmem>>, %arg5: memref<1x32xf32, #tpu.memory_space<vmem>>, %arg6: memref<32x32xbf16, #tpu.memory_space<vmem>>, %arg7: memref<1x32xf32, #tpu.memory_space<vmem>>, %arg8: memref<32x64xbf16, #tpu.memory_space<vmem>>, %arg9: memref<1x64xf32, #tpu.memory_space<vmem>>, %arg10: memref<8x64xf32, #tpu.memory_space<vmem>>) attributes {dimension_semantics = [#tpu.dimension_semantics<parallel>], iteration_bounds = array<i64: 1>, scalar_prefetch = 0 : i64, scratch_operands = 0 : i64, tpu.core_type = #tpu.core_type<tc>, window_params = [{transform_indices = @transform_0, window_bounds = array<i64: 8, 16>}, {transform_indices = @transform_1, window_bounds = array<i64: 8, 8>}, {pipeline_mode = #tpu.pipeline_mode<synchronous>, transform_indices = @transform_2, window_bounds = array<i64: 16, 32>}, {pipeline_mode = #tpu.pipeline_mode<synchronous>, transform_indices = @transform_3, window_bounds = array<i64: 8, 32>}, {pipeline_mode = #tpu.pipeline_mode<synchronous>, transform_indices = @transform_4, window_bounds = array<i64: 1, 32>}, {pipeline_mode = #tpu.pipeline_mode<synchronous>, transform_indices = @transform_5, window_bounds = array<i64: 32, 32>}, {pipeline_mode = #tpu.pipeline_mode<synchronous>, transform_indices = @transform_6, window_bounds = array<i64: 1, 32>}, {pipeline_mode = #tpu.pipeline_mode<synchronous>, transform_indices = @transform_7, window_bounds = array<i64: 32, 64>}, {pipeline_mode = #tpu.pipeline_mode<synchronous>, transform_indices = @transform_8, window_bounds = array<i64: 1, 64>}, {transform_indices = @transform_9, window_bounds = array<i64: 8, 64>}]} {
    %c0 = arith.constant 0 : index
    %c0_0 = arith.constant 0 : index
    %0 = vector.load %arg1[%c0, %c0_0] : memref<8x16xf32, #tpu.memory_space<vmem>>, vector<8x16xf32>
    %1 = arith.truncf %0 : vector<8x16xf32> to vector<8x16xbf16>
    %c0_1 = arith.constant 0 : index
    %c0_2 = arith.constant 0 : index
    %2 = vector.load %arg3[%c0_1, %c0_2] : memref<16x32xbf16, #tpu.memory_space<vmem>>, vector<16x32xbf16>
    %cst = arith.constant dense<0.000000e+00> : vector<8x32xf32>
    %3 = tpu.matmul %1, %2, %cst {dimension_numbers = #tpu.dot_dimension_numbers<[1], [0], [0], [1], [0, 0, 1, 1], [], []>} : vector<8x16xbf16>, vector<16x32xbf16>, vector<8x32xf32> -> vector<8x32xf32>
    %c0_3 = arith.constant 0 : index
    %c0_4 = arith.constant 0 : index
    %4 = vector.load %arg2[%c0_3, %c0_4] : memref<8x8xf32, #tpu.memory_space<vmem>>, vector<8x8xf32>
    %5 = arith.truncf %4 : vector<8x8xf32> to vector<8x8xbf16>
    %c0_5 = arith.constant 0 : index
    %c0_6 = arith.constant 0 : index
    %6 = vector.load %arg4[%c0_5, %c0_6] : memref<8x32xbf16, #tpu.memory_space<vmem>>, vector<8x32xbf16>
    %cst_7 = arith.constant dense<0.000000e+00> : vector<8x32xf32>
    %7 = tpu.matmul %5, %6, %cst_7 {dimension_numbers = #tpu.dot_dimension_numbers<[1], [0], [0], [1], [0, 0, 1, 1], [], []>} : vector<8x8xbf16>, vector<8x32xbf16>, vector<8x32xf32> -> vector<8x32xf32>
    %8 = arith.addf %3, %7 : vector<8x32xf32>
    %c0_8 = arith.constant 0 : index
    %c0_9 = arith.constant 0 : index
    %9 = vector.load %arg5[%c0_8, %c0_9] : memref<1x32xf32, #tpu.memory_space<vmem>>, vector<1x32xf32>
    %10 = vector.broadcast %9 : vector<1x32xf32> to vector<8x32xf32>
    %11 = arith.addf %8, %10 : vector<8x32xf32>
    %cst_10 = arith.constant 0.000000e+00 : f32
    %12 = vector.broadcast %cst_10 : f32 to vector<8x32xf32>
    %13 = arith.maximumf %11, %12 : vector<8x32xf32>
    %14 = arith.truncf %13 : vector<8x32xf32> to vector<8x32xbf16>
    %c0_11 = arith.constant 0 : index
    %c0_12 = arith.constant 0 : index
    %15 = vector.load %arg6[%c0_11, %c0_12] : memref<32x32xbf16, #tpu.memory_space<vmem>>, vector<32x32xbf16>
    %cst_13 = arith.constant dense<0.000000e+00> : vector<8x32xf32>
    %16 = tpu.matmul %14, %15, %cst_13 {dimension_numbers = #tpu.dot_dimension_numbers<[1], [0], [0], [1], [0, 0, 1, 1], [], []>} : vector<8x32xbf16>, vector<32x32xbf16>, vector<8x32xf32> -> vector<8x32xf32>
    %c0_14 = arith.constant 0 : index
    %c0_15 = arith.constant 0 : index
    %17 = vector.load %arg7[%c0_14, %c0_15] : memref<1x32xf32, #tpu.memory_space<vmem>>, vector<1x32xf32>
    %18 = vector.broadcast %17 : vector<1x32xf32> to vector<8x32xf32>
    %19 = arith.addf %16, %18 : vector<8x32xf32>
    %cst_16 = arith.constant 0.000000e+00 : f32
    %20 = vector.broadcast %cst_16 : f32 to vector<8x32xf32>
    %21 = arith.maximumf %19, %20 : vector<8x32xf32>
    %22 = arith.truncf %21 : vector<8x32xf32> to vector<8x32xbf16>
    %c0_17 = arith.constant 0 : index
    %c0_18 = arith.constant 0 : index
    %23 = vector.load %arg8[%c0_17, %c0_18] : memref<32x64xbf16, #tpu.memory_space<vmem>>, vector<32x64xbf16>
    %cst_19 = arith.constant dense<0.000000e+00> : vector<8x64xf32>
    %24 = tpu.matmul %22, %23, %cst_19 {dimension_numbers = #tpu.dot_dimension_numbers<[1], [0], [0], [1], [0, 0, 1, 1], [], []>} : vector<8x32xbf16>, vector<32x64xbf16>, vector<8x64xf32> -> vector<8x64xf32>
    %c0_20 = arith.constant 0 : index
    %c0_21 = arith.constant 0 : index
    %25 = vector.load %arg9[%c0_20, %c0_21] : memref<1x64xf32, #tpu.memory_space<vmem>>, vector<1x64xf32>
    %26 = vector.broadcast %25 : vector<1x64xf32> to vector<8x64xf32>
    %27 = arith.addf %24, %26 : vector<8x64xf32>
    %28 = tpu.iota {dimensions = array<i32: 1>} : vector<8x64xi32>
    %c32_i32 = arith.constant 32 : i32
    %29 = vector.broadcast %c32_i32 : i32 to vector<8x64xi32>
    %30 = arith.cmpi slt, %28, %29 : vector<8x64xi32>
    %cst_22 = arith.constant 0.000000e+00 : f32
    %31 = vector.broadcast %cst_22 : f32 to vector<8x64xf32>
    %32 = arith.maximumf %27, %31 : vector<8x64xf32>
    %33 = arith.select %30, %27, %32 : vector<8x64xi1>, vector<8x64xf32>
    %c0_23 = arith.constant 0 : index
    %c0_24 = arith.constant 0 : index
    %34 = vector.load %arg10[%c0_23, %c0_24] : memref<8x64xf32, #tpu.memory_space<vmem>>, vector<8x64xf32>
    tpu.vector_store %arg10[%c0_23, %c0_24], %33 {strides = array<i32>} : memref<8x64xf32, #tpu.memory_space<vmem>>, vector<8x64xf32>,
    return
  }
  func.func @transform_0(%arg0: i32) -> (i32, i32) {
    %c0_i32 = arith.constant 0 : i32
    %c0_i32_0 = arith.constant 0 : i32
    return %arg0, %c0_i32 : i32, i32
  }
  func.func @transform_1(%arg0: i32) -> (i32, i32) {
    %c0_i32 = arith.constant 0 : i32
    %c0_i32_0 = arith.constant 0 : i32
    return %arg0, %c0_i32 : i32, i32
  }
  func.func @transform_2(%arg0: i32) -> (i32, i32) {
    %c0_i32 = arith.constant 0 : i32
    %c0_i32_0 = arith.constant 0 : i32
    %c0_i32_1 = arith.constant 0 : i32
    return %c0_i32, %c0_i32_0 : i32, i32
  }
  func.func @transform_3(%arg0: i32) -> (i32, i32) {
    %c0_i32 = arith.constant 0 : i32
    %c0_i32_0 = arith.constant 0 : i32
    %c0_i32_1 = arith.constant 0 : i32
    return %c0_i32, %c0_i32_0 : i32, i32
  }
  func.func @transform_4(%arg0: i32) -> (i32, i32) {
    %c0_i32 = arith.constant 0 : i32
    %c0_i32_0 = arith.constant 0 : i32
    %c0_i32_1 = arith.constant 0 : i32
    return %c0_i32, %c0_i32_0 : i32, i32
  }
  func.func @transform_5(%arg0: i32) -> (i32, i32) {
    %c0_i32 = arith.constant 0 : i32
    %c0_i32_0 = arith.constant 0 : i32
    %c0_i32_1 = arith.constant 0 : i32
    return %c0_i32, %c0_i32_0 : i32, i32
  }
  func.func @transform_6(%arg0: i32) -> (i32, i32) {
    %c0_i32 = arith.constant 0 : i32
    %c0_i32_0 = arith.constant 0 : i32
    %c0_i32_1 = arith.constant 0 : i32
    return %c0_i32, %c0_i32_0 : i32, i32
  }
  func.func @transform_7(%arg0: i32) -> (i32, i32) {
    %c0_i32 = arith.constant 0 : i32
    %c0_i32_0 = arith.constant 0 : i32
    %c0_i32_1 = arith.constant 0 : i32
    return %c0_i32, %c0_i32_0 : i32, i32
  }
  func.func @transform_8(%arg0: i32) -> (i32, i32) {
    %c0_i32 = arith.constant 0 : i32
    %c0_i32_0 = arith.constant 0 : i32
    %c0_i32_1 = arith.constant 0 : i32
    return %c0_i32, %c0_i32_0 : i32, i32
  }
  func.func @transform_9(%arg0: i32) -> (i32, i32) {
    %c0_i32 = arith.constant 0 : i32
    %c0_i32_0 = arith.constant 0 : i32
    return %arg0, %c0_i32 : i32, i32
  }
}

</mosaic_0001>

<bundles_post_ra>
// kernel: tpu_custom_call.1
= control target key start
LH: loop header
LB: loop body
LE: loop exit
PB: predicated region body
PF: predicated region fallthrough
CT: control target
= control target key end

     0   :  { %14 = vsyncpa [#allocation3], 0  ;;  %s733_s0 = inlined_call_operand.hbm [shape: f32[8,16], index: 0, kind: input, shape index: {}]   ;;  %s734_s1 = inlined_call_operand.hbm [shape: f32[8,8], index: 1, kind: input, shape index: {}]   ;;  %s735_s2 = inlined_call_operand.hbm [shape: bf16[16,32], index: 2, kind: input, shape index: {}]   ;;  %s736_s3 = inlined_call_operand.hbm [shape: bf16[8,32], index: 3, kind: input, shape index: {}]   ;;  %s737_s4 = inlined_call_operand.vmem [shape: f32[1,32], index: 4, kind: input, shape index: {}]   ;;  %s738_s5 = inlined_call_operand.vmem [shape: bf16[32,32], index: 5, kind: input, shape index: {}]   ;;  %s739_s6 = inlined_call_operand.vmem [shape: f32[1,32], index: 6, kind: input, shape index: {}]   ;;  %s740_s7 = inlined_call_operand.hbm [shape: bf16[32,64], index: 7, kind: input, shape index: {}]   ;;  %s741_s8 = inlined_call_operand.vmem [shape: f32[1,64], index: 8, kind: input, shape index: {}]   ;;  %s742_s9 = inlined_call_operand.hbm [shape: f32[8,64], index: 9, kind: output, shape index: {}]  }
   0x1   :  { %15 = vsyncpa [#allocation6], 0 }
   0x2   :  { %16 = vsyncpa [#allocation9], 0 }
   0x3   :  { %17 = vsyncpa [#allocation4], 0  ;;  %s575_s30 = smov [#allocation5]   ;;  %s576_s11 = smov [#allocation8]  }
   0x4   :  { %s34_s10 = sshll.u32 %s575_s30, 4  ;;  %s56_s12 = sshll.u32 %s576_s11, 4  ;;  %s35_s10 = int_to_ptr.vmem [resolvable:$true] %s34_s10  ;;  %s57_s12 = int_to_ptr.vmem [resolvable:$true] %s56_s12 }
   0x5   :  { %s435_s15 = scalar_lea.hbm %s734_s1, 128 }
   0x6   :  { %p436_p0 = scmp.ne.s32.totalorder %s734_s1, %s435_s15  ;;  %p439_p1 = scmp.lt.u32.totalorder %s435_s15, %s734_s1 }
   0x8   :  { %p441_p2 = pnand %p439_p1, %p436_p0 }
   0xa   :  { %444 = shalt.err (!%p441_p2)
}
   0xb   :  { %s445_s20 = scalar_lea.vmem %s35_s10, 128  ;;  %p450_p4 = scmp.lt.s32.totalorder %s35_s10, %s35_s10 }
   0xc   :  { %p446_p3 = scmp.ne.s32.totalorder %s35_s10, %s445_s20  ;;  %p451_p5 = scmp.lt.s32.totalorder %s445_s20, %s445_s20 }
   0xe   :  { %p452_p6 = por %p451_p5, %p450_p4 }
  0x10   :  { %p453_p7 = pnand %p452_p6, %p446_p3 }
  0x12   :  { %456 = shalt.err (!%p453_p7)
}
  0x13   :  { %37 = dma.hbm_to_vmem [thread:$0]  %s734_s1, 128, %s35_s10, [#allocation6]  }
  0x14   :  { %s457_s25 = scalar_lea.hbm %s736_s3, 64 }
  0x15   :  { %p458_p8 = scmp.ne.s32.totalorder %s736_s3, %s457_s25  ;;  %p461_p9 = scmp.lt.u32.totalorder %s457_s25, %s736_s3 }
  0x17   :  { %p463_p10 = pnand %p461_p9, %p458_p8 }
  0x19   :  { %466 = shalt.err (!%p463_p10)
}
  0x1a   :  { %s467_s30 = scalar_lea.vmem %s57_s12, 64  ;;  %p472_p12 = scmp.lt.s32.totalorder %s57_s12, %s57_s12 }
  0x1b   :  { %p468_p11 = scmp.ne.s32.totalorder %s57_s12, %s467_s30  ;;  %p473_p13 = scmp.lt.s32.totalorder %s467_s30, %s467_s30 }
  0x1d   :  { %p474_p0 = por %p473_p13, %p472_p12 }
  0x1f   :  { %p475_p1 = pnand %p474_p0, %p468_p11 }
  0x21   :  { %478 = shalt.err (!%p475_p1)
}
  0x22   :  { %59 = dma.hbm_to_vmem [thread:$0]  %s736_s3, 64, %s57_s12, [#allocation9]  }
  0x23   :  { %s577_s11 = smov [#allocation2]   ;;  %s578_s14 = smov [#allocation7]  }
  0x24   :  { %s24_s13 = sshll.u32 %s577_s11, 4  ;;  %s43_s15 = sshll.u32 %s578_s14, 4  ;;  %s25_s13 = int_to_ptr.vmem [resolvable:$true] %s24_s13  ;;  %s659_s15 = int_to_ptr.vmem [resolvable:$true] %s43_s15 }
  0x25   :  { %s479_s18 = scalar_lea.hbm %s733_s0, 128 }
  0x26   :  { %p480_p2 = scmp.ne.s32.totalorder %s733_s0, %s479_s18  ;;  %p483_p3 = scmp.lt.u32.totalorder %s479_s18, %s733_s0 }
  0x28   :  { %p485_p4 = pnand %p483_p3, %p480_p2 }
  0x2a   :  { %488 = shalt.err (!%p485_p4)
}
  0x2b   :  { %s489_s3 = scalar_lea.vmem %s25_s13, 128  ;;  %p494_p6 = scmp.lt.s32.totalorder %s25_s13, %s25_s13 }
  0x2c   :  { %p490_p5 = scmp.ne.s32.totalorder %s25_s13, %s489_s3  ;;  %p495_p7 = scmp.lt.s32.totalorder %s489_s3, %s489_s3 }
  0x2e   :  { %p496_p8 = por %p495_p7, %p494_p6 }
  0x30   :  { %p497_p9 = pnand %p496_p8, %p490_p5 }
  0x32   :  { %500 = shalt.err (!%p497_p9)
}
  0x33   :  { %27 = dma.hbm_to_vmem [thread:$0]  %s733_s0, 128, %s25_s13, [#allocation3]  }
  0x34   :  { %s501_s26 = scalar_lea.hbm %s735_s2, 128 }
  0x35   :  { %p502_p10 = scmp.ne.s32.totalorder %s735_s2, %s501_s26  ;;  %p505_p11 = scmp.lt.u32.totalorder %s501_s26, %s735_s2 }
  0x37   :  { %p507_p12 = pnand %p505_p11, %p502_p10 }
  0x39   :  { %510 = shalt.err (!%p507_p12)
}
  0x3a   :  { %s511_s1 = scalar_lea.vmem %s659_s15, 128  ;;  %p516_p0 = scmp.lt.s32.totalorder %s659_s15, %s659_s15 }
  0x3b   :  { %p512_p13 = scmp.ne.s32.totalorder %s659_s15, %s511_s1  ;;  %p517_p1 = scmp.lt.s32.totalorder %s511_s1, %s511_s1 }
  0x3d   :  { %p518_p2 = por %p517_p1, %p516_p0 }
  0x3f   :  { %p519_p3 = pnand %p518_p2, %p512_p13 }
  0x41   :  { %522 = shalt.err (!%p519_p3)
}
  0x42   :  { %s579_s0 = smov 64   ;;  %s580_s10 = smov 4  }
  0x43   :  { %49 = dma.hbm_to_vmem [thread:$0]  %s735_s2, 128, %s659_s15, [#allocation6], %s579_s0, %s579_s0, %s580_s10  }
  0x44   :  { %s581_s14 = smov [#allocation10]   ;;  %s523_s19 = scalar_lea.hbm %s740_s7, 256 }
  0x45   :  { %s71_s16 = sshll.u32 %s581_s14, 4  ;;  %p524_p4 = scmp.ne.s32.totalorder %s740_s7, %s523_s19  ;;  %s72_s16 = int_to_ptr.vmem [resolvable:$true] %s71_s16 }
  0x46   :  { %p527_p5 = scmp.lt.u32.totalorder %s523_s19, %s740_s7 }
  0x48   :  { %p529_p6 = pnand %p527_p5, %p524_p4 }
  0x4a   :  { %532 = shalt.err (!%p529_p6)
}
  0x4b   :  { %s533_s12 = scalar_lea.vmem %s72_s16, 256  ;;  %p538_p8 = scmp.lt.s32.totalorder %s72_s16, %s72_s16 }
  0x4c   :  { %p534_p7 = scmp.ne.s32.totalorder %s72_s16, %s533_s12  ;;  %p539_p9 = scmp.lt.s32.totalorder %s533_s12, %s533_s12 }
  0x4e   :  { %p540_p10 = por %p539_p9, %p538_p8 }
  0x50   :  { %p541_p11 = pnand %p540_p10, %p534_p7 }
  0x52   :  { %544 = shalt.err (!%p541_p11)
}
  0x53   :  { %77 = dma.hbm_to_vmem [thread:$0]  %s740_s7, 256, %s72_s16, [#allocation9], %s579_s0, %s579_s0, %s580_s10  }
  0x54   :  { %567 = dma.done.wait [#allocation3], 128  }
  0x55   :  { %568 = vsyncadd [#allocation3], 4294967168 }
  0x56   :  { %569 = dma.done.wait [#allocation6], 256  }
  0x57   :  { %570 = vsyncadd [#allocation6], 4294967040 }
  0x58   :  { %571 = dma.done.wait [#allocation9], 320  }
  0x59   :  { %572 = vsyncadd [#allocation9], 4294966976  ;;  %v582_v0 = vmov 0.0   ;;  %vm583_vm0 = vmmov 0   ;;  %vm107_vm1 = vcmask 1043456   ;;  %v430_v3 = vld [vmem:[#allocation7] sm:$0xff]   ;;  %v346_v33 = vlaneseq }
  0x5a   :  { %392 = vmatprep.subr.bf16.mxu0 %v582_v0  ;;  %398 = vmatprep.subr.bf16.mxu1 %v582_v0  ;;  %v102_v1 = vld [vmem:[#allocation8] sm:$0xf]  ;;  %v100_v4 = vld [vmem:[#allocation5] sm:$0xff]  ;;  %vm103_vm2 = vcmask 64512   ;;  %v96_v5 = vld [vmem:[#allocation2] sm:$0xff]  ;;  %vm157_vm3 = vcmask 130048  }
  0x5b   :  { %394 = vmatprep.mubr.msk.bf16.mxu0 %vm583_vm0, %v582_v0  ;;  %400 = vmatprep.mubr.msk.bf16.mxu1 %vm583_vm0, %v582_v0  ;;  %v109_v2 = vsel %vm107_vm1, %v102_v1, 0  ;;  %v101_v6 = vpack.c.bf16 %v100_v4, %v100_v4  ;;  %v97_v7 = vpack.c.bf16 %v96_v5, %v96_v5  ;;  %v431_v8 = vld [vmem:[%s738_s5] sm:$0xff]   ;;  %v432_v9 = vld [vmem:[%s738_s5 + $0x8] sm:$0xff]   ;;  %vm234_vm4 = vcmask 261120   ;;  %v434_v24 = vld [vmem:[#allocation10 + $0x8] sm:$0xff]   ;;  %s584_s30 = smov [#allocation11]  }
  0x5c   :  { %393 = vmatpush3.bf16.msra.mxu0 %v109_v2  ;;  %399 = vmatpush3.bf16.msra.mxu1 %v430_v3  ;;  %v433_v10 = vld [vmem:[#allocation10] sm:$0xff]   ;;  %v373_v14 = vld [vmem:[%s737_s4] ss:$0 sm:$0xff]  ;;  %v347_v35 = vand.u32 127, %v346_v33  ;;  %s359_s1 = sshll.u32 %s584_s30, 4  ;;  %vm351_vm6 = vcmask 523264   ;;  %s360_s1 = int_to_ptr.vmem [resolvable:$true] %s359_s1 }
  0x5d   :  { %404 = vmatprep.subr.bf16.mxu0 %v582_v0  ;;  %412 = vmatprep.subr.bf16.mxu1 %v582_v0  ;;  %v374_v25 = vld [vmem:[%s739_s6] ss:$0 sm:$0xff]  ;;  %s545_s6 = scalar_lea.vmem %s360_s1, 128  ;;  %p550_p13 = scmp.lt.s32.totalorder %s360_s1, %s360_s1 }
  0x5e   :  { %v378_v34 = vld [vmem:[%s741_s8] ss:$0 sm:$0xff]  ;;  %vm348_vm5 = vcmp.lt.s32.totalorder %v347_v35, 32  ;;  %p546_p12 = scmp.ne.s32.totalorder %s360_s1, %s545_s6  ;;  %p551_p0 = scmp.lt.s32.totalorder %s545_s6, %s545_s6 }
  0x5f   :  { %395 = vmatmul.mubr.msk.bf16.vlgmr.msra.gmra.mrb[0].mxu0 %vm103_vm2, %v101_v6  ;;  %401 = vmatmul.mubr.msk.bf16.vlgmr.msra.gmra.mrb[0].mxu1 %vm157_vm3, %v97_v7 }
  0x60   :  { %408 = vmatprep.mubr.msk.bf16.mxu0 %vm583_vm0, %v582_v0  ;;  %416 = vmatprep.mubr.msk.bf16.mxu1 %vm583_vm0, %v582_v0  ;;  %p552_p1 = por %p551_p0, %p550_p13 }
  0x61   :  { %405 = vmatpush3.bf16.msra.mxu0 %v431_v8  ;;  %413 = vmatpush3.bf16.msra.mxu1 %v433_v10 }
  0x62   :  { %406 = vmatprep.subr.bf16.mxu0 %v582_v0  ;;  %414 = vmatprep.subr.bf16.mxu1 %v582_v0  ;;  %p553_p2 = pnand %p552_p1, %p546_p12 }
  0x65   :  { %407 = vmatpush3.bf16.msra.mxu0 %v432_v9  ;;  %415 = vmatpush3.bf16.msra.mxu1 %v434_v24 }
 0x132   :  { %v145_v11 = vpop.f32.mrb[0].mxu0  ;;  %v195_v13 = vpop.f32.mrb[0].mxu1 }
 0x133   :  { %v396_v12 = vpop.f32.mrb[1].mxu0  ;;  %v196_v15 = vadd.f32 %v195_v13, %v145_v11  ;;  %v402_v17 = vpop.f32.mrb[1].mxu1 }
 0x134   :  { %v148_v16 = vpop.f32.mrb[2].mxu0  ;;  %v198_v19 = vpop.f32.mrb[2].mxu1 }
 0x135   :  { %v397_v18 = vpop.f32.mrb[3].mxu0  ;;  %v208_v20 = vadd.f32 %v373_v14, %v196_v15  ;;  %v403_v21 = vpop.f32.mrb[3].mxu1 }
 0x137   :  { %v209_v22 = vmax.f32 %v208_v20, 0.0 }
 0x139   :  { %v210_v23 = vpack.c.bf16 %v209_v22, %v209_v22 }
 0x13b   :  { %409 = vmatmul.mubr.msk.bf16.vlgmr.msra.gmra.mrb[4].mxu0 %vm234_vm4, %v210_v23 }
 0x20e   :  { %v272_v26 = vpop.f32.mrb[4].mxu0 }
 0x20f   :  { %v273_v27 = vadd.f32 %v374_v25, %v272_v26  ;;  %v410_v28 = vpop.f32.mrb[5].mxu0 }
 0x210   :  { %v275_v29 = vpop.f32.mrb[6].mxu0 }
 0x211   :  { %v278_v30 = vmax.f32 %v273_v27, 0.0  ;;  %v411_v31 = vpop.f32.mrb[7].mxu0 }
 0x213   :  { %v279_v32 = vpack.c.bf16 %v278_v30, %v278_v30 }
 0x215   :  { %417 = vmatmul.mubr.msk.bf16.vlgmr.msra.gmra.mrb[4].mxu1 %vm234_vm4, %v279_v32 }
 0x2e8   :  { %v340_v36 = vpop.f32.mrb[4].mxu1 }
 0x2e9   :  { %v341_v37 = vadd.f32 %v378_v34, %v340_v36  ;;  %v418_v38 = vpop.f32.mrb[5].mxu1 }
 0x2ea   :  { %v343_v39 = vpop.f32.mrb[6].mxu1 }
 0x2eb   :  { %v349_v40 = vmax.f32 %v341_v37, 0.0  ;;  %v419_v41 = vpop.f32.mrb[7].mxu1 }
 0x2ed   :  { %v350_v42 = vsel %vm348_vm5, %v341_v37, %v349_v40 }
 0x2ee   :  { %352 = vst.msk [vmem:[#allocation11] sm:$0xff] %vm351_vm6, %v350_v42 }
 0x2ef   :  { %556 = shalt.err (!%p553_p2)
}
 0x2f0   :  { %s557_s10 = scalar_lea.hbm %s742_s9, 128 }
 0x2f1   :  { %p558_p3 = scmp.ne.s32.totalorder %s742_s9, %s557_s10  ;;  %p561_p4 = scmp.lt.u32.totalorder %s557_s10, %s742_s9 }
 0x2f3   :  { %p563_p5 = pnand %p561_p4, %p558_p3 }
 0x2f5   :  { %566 = shalt.err (!%p563_p5)
}
 0x2f6   :  { %362 = dma.vmem_to_hbm [thread:$0]  %s360_s1, 128, %s742_s9, [#allocation4]  }
 0x2f7   :  { %573 = dma.done.wait [#allocation4], 128  }
 0x2f8   :  { %574 = vsyncadd [#allocation4], 4294967168 }
 0x2f9   :  { %366 = vsyncpa [#allocation3], 1 }
 0x2fa   :  { %367 = vsyncpa [#allocation6], 1 }
 0x2fb   :  { %368 = vsyncpa [#allocation9], 1 }
 0x2fc   :  { %369 = vsyncpa [#allocation4], 1 }

</bundles_post_ra>
